<compile_context>
chip_gen: v5e
topology: v5e:2x2
jax: 0.10.0
libtpu: 0.0.40
codegen_flags: <defaults>
</compile_context>

<pallas_src>
import functools
import math

import jax
import jax.numpy as jnp
from jax.experimental import pallas as pl
from jax.experimental.pallas import tpu as pltpu

THRESH = 1.0   # LIFSpike default threshold
TAU = 0.5      # LIFSpike default membrane decay


# -------------------- Pallas kernels --------------------

def _sconv1_kernel(p_ref, w_ref, b_ref, o_ref):
    """Layer 1: conv(1->8)+BN (as transposed matmul) + LIF over T.

    p_ref: (9, HW)      im2col^T of ONE input frame (time-deduped)
    w_ref: (Cout, 9)    BN-folded conv weights
    b_ref: (Cout, 1)    BN-folded conv bias
    o_ref: (T, Cout, HW) output spikes
    """
    T = o_ref.shape[0]
    # lane-dense output: pixels (HW) on the lane axis, channels on sublanes
    u = jnp.dot(w_ref[...], p_ref[...], preferred_element_type=jnp.float32) + b_ref[...]
    mem = jnp.zeros_like(u)
    for t in range(T):                      # static unroll (T small)
        mem = mem * TAU + u                 # same drive every step (input repeated over T)
        # fire at mem - thresh >= 0 (matches reference surrogate heaviside)
        spike = (mem >= THRESH).astype(jnp.float32)
        o_ref[t] = spike
        mem = (1.0 - spike) * mem           # hard reset
    return


def _sconv2_kernel(p_ref, w_ref, b_ref, o_ref):
    """Layer 2: conv(8->16)+BN (transposed matmul) + LIF over T.

    p_ref: (T, K, HW)   im2col^T of the pooled layer-1 spikes, per time step
    w_ref: (Cout, K)
    b_ref: (Cout, 1)
    o_ref: (T, Cout, HW)
    """
    T, Cout, HW = o_ref.shape
    w = w_ref[...]
    b = b_ref[...]
    mem = jnp.zeros((Cout, HW), jnp.float32)
    for t in range(T):                      # static unroll
        u = jnp.dot(w, p_ref[t], preferred_element_type=jnp.float32) + b
        mem = mem * TAU + u
        spike = (mem >= THRESH).astype(jnp.float32)
        o_ref[t] = spike
        mem = (1.0 - spike) * mem
    return


# -------------------- pallas_call wrappers --------------------

def sconv1(patches, w_mat, b_col, T):
    """patches: (B, 9, HW) -> spikes (B, T, Cout, HW)."""
    B, K, HW = patches.shape
    Cout = w_mat.shape[0]
    return pl.pallas_call(
        _sconv1_kernel,
        out_shape=jax.ShapeDtypeStruct((B, T, Cout, HW), jnp.float32),
        grid_spec=pltpu.PrefetchScalarGridSpec(
            num_scalar_prefetch=0,
            grid=(B,),
            in_specs=[
                pl.BlockSpec((None, K, HW), lambda b: (b, 0, 0)),
                pl.BlockSpec((Cout, K), lambda b: (0, 0)),
                pl.BlockSpec((Cout, 1), lambda b: (0, 0)),
            ],
            out_specs=pl.BlockSpec((None, T, Cout, HW), lambda b: (b, 0, 0, 0)),
        ),
        compiler_params=pltpu.CompilerParams(dimension_semantics=("parallel",)),
    )(patches, w_mat, b_col)


def sconv2(patches, w_mat, b_col):
    """patches: (B, T, K, HW) -> spikes (B, T, Cout, HW)."""
    B, T, K, HW = patches.shape
    Cout = w_mat.shape[0]
    return pl.pallas_call(
        _sconv2_kernel,
        out_shape=jax.ShapeDtypeStruct((B, T, Cout, HW), jnp.float32),
        grid_spec=pltpu.PrefetchScalarGridSpec(
            num_scalar_prefetch=0,
            grid=(B,),
            in_specs=[
                pl.BlockSpec((None, T, K, HW), lambda b: (b, 0, 0, 0)),
                pl.BlockSpec((Cout, K), lambda b: (0, 0)),
                pl.BlockSpec((Cout, 1), lambda b: (0, 0)),
            ],
            out_specs=pl.BlockSpec((None, T, Cout, HW), lambda b: (b, 0, 0, 0)),
        ),
        compiler_params=pltpu.CompilerParams(dimension_semantics=("parallel",)),
    )(patches, w_mat, b_col)


# -------------------- JAX glue (tiny tensors; layout plumbing only) --------------------

def im2col_T(x):
    """(..., C, H, W), 3x3, stride 1, pad 1 -> (..., 9*C, H*W).

    Rows ordered (kh*3+kw)*C + ci, matching fold_bn's weight column order.
    """
    *lead, C, H, W = x.shape
    xp = jnp.pad(x, [(0, 0)] * len(lead) + [(0, 0), (1, 1), (1, 1)])
    cols = [xp[..., kh:kh + H, kw:kw + W] for kh in range(3) for kw in range(3)]
    p = jnp.stack(cols, axis=-4)                  # (..., 9, C, H, W)
    return p.reshape(*lead, 9 * C, H * W)


def avgpool2(x):
    """nn.AvgPool2d(2) on (..., C, H, W) with even H, W (tiny; done in XLA)."""
    *lead, C, H, W = x.shape
    return x.reshape(*lead, C, H // 2, 2, W // 2, 2).mean(axis=(-3, -1))


def fold_bn(w, b, eps=1e-5):
    """Fold eval-mode BatchNorm (default stats: mean=0, var=1, gamma=1, beta=0) into conv.

    w: (3, 3, Cin, Cout) -> (Cout, 9*Cin) with column order (kh, kw, ci); b -> (Cout, 1).
    """
    scale = 1.0 / math.sqrt(1.0 + eps)
    cout = w.shape[-1]
    w_mat = jnp.transpose(w, (3, 0, 1, 2)).reshape(cout, -1) * scale
    b_col = (b * scale).reshape(cout, 1)
    return w_mat.astype(jnp.float32), b_col.astype(jnp.float32)


def vggsnn_mini_forward(x_nchw, params, T):
    """Mirrors VGGSNN_MINI.forward (num_classes == 10, 28x28 single-channel input)."""
    B = x_nchw.shape[0]

    # --- SConv(1, 8) + LIF: conv+BN computed ONCE per frame (input is repeated over T) ---
    p1 = im2col_T(x_nchw)                                   # (B, 9, 784)
    s1 = sconv1(p1, params["w1_mat"], params["b1_col"], T)  # (B, T, 8, 784)
    s1 = s1.reshape(B, T, 8, 28, 28)

    # --- AvgPool2d(2) + im2col for layer 2 (tiny XLA gathers) ---
    q1 = avgpool2(s1)                                       # (B, T, 8, 14, 14)
    p2 = im2col_T(q1)                                       # (B, T, 72, 196)

    # --- SConv(8, 16) + LIF ---
    s2 = sconv2(p2, params["w2_mat"], params["b2_col"])     # (B, T, 16, 196)
    s2 = s2.reshape(B, T, 16, 14, 14)

    # --- AvgPool2d(2), flatten in (C, H, W) order, classifier (plain jnp.dot) ---
    q2 = avgpool2(s2)                                       # (B, T, 16, 7, 7)
    feat = q2.reshape(B, T, 16 * 7 * 7)                     # == torch.flatten(x, 2)
    logits = jnp.dot(feat, params["fc_w"]) + params["fc_b"] # (B, T, 10)
    return logits


def init_params(key, num_classes=10):
    ks = jax.random.split(key, 6)
    # Conv2d(1, 8, 3): kaiming_normal_, mode='fan_out' -> std = sqrt(2 / (Cout*9))
    w1 = jax.random.normal(ks[0], (3, 3, 1, 8), jnp.float32) * math.sqrt(2.0 / (8 * 9))
    b1 = jax.random.uniform(ks[1], (8,), jnp.float32, -1.0, 1.0) / math.sqrt(1 * 9)
    # Conv2d(8, 16, 3)
    w2 = jax.random.normal(ks[2], (3, 3, 8, 16), jnp.float32) * math.sqrt(2.0 / (16 * 9))
    b2 = jax.random.uniform(ks[3], (16,), jnp.float32, -1.0, 1.0) / math.sqrt(8 * 9)

    w1_mat, b1_col = fold_bn(w1, b1)
    w2_mat, b2_col = fold_bn(w2, b2)

    # classifier: Linear(16 * 7 * 7, num_classes)
    fan_in = 16 * 7 * 7
    fc_w = jax.random.uniform(ks[4], (fan_in, num_classes), jnp.float32, -1.0, 1.0) / math.sqrt(fan_in)
    fc_b = jax.random.uniform(ks[5], (num_classes,), jnp.float32, -1.0, 1.0) / math.sqrt(fan_in)
    return dict(w1_mat=w1_mat, b1_col=b1_col, w2_mat=w2_mat, b2_col=b2_col,
                fc_w=fc_w, fc_b=fc_b)


if __name__ == "__main__":
    key = jax.random.PRNGKey(0)
    kp, kx = jax.random.split(key)
    params = init_params(kp, num_classes=10)

    # self.T is set externally in the reference code; fix T = 4 here.
    T = 4
    # Input spatial size must be 28x28 (classifier expects 16 * 7 * 7 features).
    x = jax.random.normal(kx, (2, 1, 28, 28), jnp.float32)

    fwd = jax.jit(functools.partial(vggsnn_mini_forward, T=T))
    out = jax.block_until_ready(fwd(x, params))
    assert out.shape == (2, T, 10), out.shape
    assert bool(jnp.all(jnp.isfinite(out)))
    print("KERNEL_OK")
</pallas_src>

<mosaic_0001>
module attributes {stable_mosaic.version = 11 : i64} {
  func.func @_sconv1_kernel(%arg0: i32, %arg1: memref<1x9x784xf32, #tpu.memory_space<vmem>>, %arg2: memref<8x9xf32, #tpu.memory_space<vmem>>, %arg3: memref<8x1xf32, #tpu.memory_space<vmem>>, %arg4: memref<1x4x8x784xf32, #tpu.memory_space<vmem>>) attributes {dimension_semantics = [#tpu.dimension_semantics<parallel>], iteration_bounds = array<i64: 2>, scalar_prefetch = 0 : i64, scratch_operands = 0 : i64, tpu.core_type = #tpu.core_type<tc>, window_params = [{transform_indices = @transform_0, window_bounds = array<i64: 1, 9, 784>}, {pipeline_mode = #tpu.pipeline_mode<synchronous>, transform_indices = @transform_1, window_bounds = array<i64: 8, 9>}, {pipeline_mode = #tpu.pipeline_mode<synchronous>, transform_indices = @transform_2, window_bounds = array<i64: 8, 1>}, {transform_indices = @transform_3, window_bounds = array<i64: 1, 4, 8, 784>}]} {
    %c0 = arith.constant 0 : index
    %c0_0 = arith.constant 0 : index
    %0 = vector.load %arg2[%c0, %c0_0] : memref<8x9xf32, #tpu.memory_space<vmem>>, vector<8x9xf32>
    %c0_1 = arith.constant 0 : index
    %c0_2 = arith.constant 0 : index
    %c0_3 = arith.constant 0 : index
    %1 = vector.load %arg1[%c0_1, %c0_2, %c0_3] : memref<1x9x784xf32, #tpu.memory_space<vmem>>, vector<1x9x784xf32>
    %2 = vector.shape_cast %1 : vector<1x9x784xf32> to vector<9x784xf32>
    %cst = arith.constant dense<0.000000e+00> : vector<8x784xf32>
    %3 = tpu.matmul %0, %2, %cst {dimension_numbers = #tpu.dot_dimension_numbers<[1], [0], [0], [1], [0, 0, 1, 1], [], []>} : vector<8x9xf32>, vector<9x784xf32>, vector<8x784xf32> -> vector<8x784xf32>
    %c0_4 = arith.constant 0 : index
    %c0_5 = arith.constant 0 : index
    %4 = vector.load %arg3[%c0_4, %c0_5] : memref<8x1xf32, #tpu.memory_space<vmem>>, vector<8x1xf32>
    %5 = vector.broadcast %4 : vector<8x1xf32> to vector<8x784xf32>
    %6 = arith.addf %3, %5 : vector<8x784xf32>
    %cst_6 = arith.constant 0.000000e+00 : f32
    %7 = vector.broadcast %cst_6 : f32 to vector<8x784xf32>
    %cst_7 = arith.constant 5.000000e-01 : f32
    %8 = vector.broadcast %cst_7 : f32 to vector<8x784xf32>
    %9 = arith.mulf %7, %8 : vector<8x784xf32>
    %10 = arith.addf %9, %6 : vector<8x784xf32>
    %cst_8 = arith.constant 1.000000e+00 : f32
    %11 = vector.broadcast %cst_8 : f32 to vector<8x784xf32>
    %12 = arith.cmpf oge, %10, %11 : vector<8x784xf32>
    %13 = arith.extui %12 : vector<8x784xi1> to vector<8x784xi32>
    %14 = arith.sitofp %13 : vector<8x784xi32> to vector<8x784xf32>
    %c0_9 = arith.constant 0 : index
    %c0_10 = arith.constant 0 : index
    %c0_11 = arith.constant 0 : index
    %c0_12 = arith.constant 0 : index
    %15 = vector.load %arg4[%c0_9, %c0_10, %c0_11, %c0_12] : memref<1x4x8x784xf32, #tpu.memory_space<vmem>>, vector<1x1x8x784xf32>
    %16 = vector.shape_cast %15 : vector<1x1x8x784xf32> to vector<8x784xf32>
    %17 = vector.shape_cast %14 : vector<8x784xf32> to vector<1x1x8x784xf32>
    tpu.vector_store %arg4[%c0_9, %c0_10, %c0_11, %c0_12], %17 {strides = array<i32>} : memref<1x4x8x784xf32, #tpu.memory_space<vmem>>, vector<1x1x8x784xf32>,
    %cst_13 = arith.constant 1.000000e+00 : f32
    %18 = vector.broadcast %cst_13 : f32 to vector<8x784xf32>
    %19 = arith.subf %18, %14 : vector<8x784xf32>
    %20 = arith.mulf %19, %10 : vector<8x784xf32>
    %cst_14 = arith.constant 5.000000e-01 : f32
    %21 = vector.broadcast %cst_14 : f32 to vector<8x784xf32>
    %22 = arith.mulf %20, %21 : vector<8x784xf32>
    %23 = arith.addf %22, %6 : vector<8x784xf32>
    %cst_15 = arith.constant 1.000000e+00 : f32
    %24 = vector.broadcast %cst_15 : f32 to vector<8x784xf32>
    %25 = arith.cmpf oge, %23, %24 : vector<8x784xf32>
    %26 = arith.extui %25 : vector<8x784xi1> to vector<8x784xi32>
    %27 = arith.sitofp %26 : vector<8x784xi32> to vector<8x784xf32>
    %c0_16 = arith.constant 0 : index
    %c1 = arith.constant 1 : index
    %c0_17 = arith.constant 0 : index
    %c0_18 = arith.constant 0 : index
    %28 = vector.load %arg4[%c0_16, %c1, %c0_17, %c0_18] : memref<1x4x8x784xf32, #tpu.memory_space<vmem>>, vector<1x1x8x784xf32>
    %29 = vector.shape_cast %28 : vector<1x1x8x784xf32> to vector<8x784xf32>
    %30 = vector.shape_cast %27 : vector<8x784xf32> to vector<1x1x8x784xf32>
    tpu.vector_store %arg4[%c0_16, %c1, %c0_17, %c0_18], %30 {strides = array<i32>} : memref<1x4x8x784xf32, #tpu.memory_space<vmem>>, vector<1x1x8x784xf32>,
    %cst_19 = arith.constant 1.000000e+00 : f32
    %31 = vector.broadcast %cst_19 : f32 to vector<8x784xf32>
    %32 = arith.subf %31, %27 : vector<8x784xf32>
    %33 = arith.mulf %32, %23 : vector<8x784xf32>
    %cst_20 = arith.constant 5.000000e-01 : f32
    %34 = vector.broadcast %cst_20 : f32 to vector<8x784xf32>
    %35 = arith.mulf %33, %34 : vector<8x784xf32>
    %36 = arith.addf %35, %6 : vector<8x784xf32>
    %cst_21 = arith.constant 1.000000e+00 : f32
    %37 = vector.broadcast %cst_21 : f32 to vector<8x784xf32>
    %38 = arith.cmpf oge, %36, %37 : vector<8x784xf32>
    %39 = arith.extui %38 : vector<8x784xi1> to vector<8x784xi32>
    %40 = arith.sitofp %39 : vector<8x784xi32> to vector<8x784xf32>
    %c0_22 = arith.constant 0 : index
    %c2 = arith.constant 2 : index
    %c0_23 = arith.constant 0 : index
    %c0_24 = arith.constant 0 : index
    %41 = vector.load %arg4[%c0_22, %c2, %c0_23, %c0_24] : memref<1x4x8x784xf32, #tpu.memory_space<vmem>>, vector<1x1x8x784xf32>
    %42 = vector.shape_cast %41 : vector<1x1x8x784xf32> to vector<8x784xf32>
    %43 = vector.shape_cast %40 : vector<8x784xf32> to vector<1x1x8x784xf32>
    tpu.vector_store %arg4[%c0_22, %c2, %c0_23, %c0_24], %43 {strides = array<i32>} : memref<1x4x8x784xf32, #tpu.memory_space<vmem>>, vector<1x1x8x784xf32>,
    %cst_25 = arith.constant 1.000000e+00 : f32
    %44 = vector.broadcast %cst_25 : f32 to vector<8x784xf32>
    %45 = arith.subf %44, %40 : vector<8x784xf32>
    %46 = arith.mulf %45, %36 : vector<8x784xf32>
    %cst_26 = arith.constant 5.000000e-01 : f32
    %47 = vector.broadcast %cst_26 : f32 to vector<8x784xf32>
    %48 = arith.mulf %46, %47 : vector<8x784xf32>
    %49 = arith.addf %48, %6 : vector<8x784xf32>
    %cst_27 = arith.constant 1.000000e+00 : f32
    %50 = vector.broadcast %cst_27 : f32 to vector<8x784xf32>
    %51 = arith.cmpf oge, %49, %50 : vector<8x784xf32>
    %52 = arith.extui %51 : vector<8x784xi1> to vector<8x784xi32>
    %53 = arith.sitofp %52 : vector<8x784xi32> to vector<8x784xf32>
    %c0_28 = arith.constant 0 : index
    %c3 = arith.constant 3 : index
    %c0_29 = arith.constant 0 : index
    %c0_30 = arith.constant 0 : index
    %54 = vector.load %arg4[%c0_28, %c3, %c0_29, %c0_30] : memref<1x4x8x784xf32, #tpu.memory_space<vmem>>, vector<1x1x8x784xf32>
    %55 = vector.shape_cast %54 : vector<1x1x8x784xf32> to vector<8x784xf32>
    %56 = vector.shape_cast %53 : vector<8x784xf32> to vector<1x1x8x784xf32>
    tpu.vector_store %arg4[%c0_28, %c3, %c0_29, %c0_30], %56 {strides = array<i32>} : memref<1x4x8x784xf32, #tpu.memory_space<vmem>>, vector<1x1x8x784xf32>,
    return
  }
  func.func @transform_0(%arg0: i32) -> (i32, i32, i32) {
    %c0_i32 = arith.constant 0 : i32
    %c0_i32_0 = arith.constant 0 : i32
    %c0_i32_1 = arith.constant 0 : i32
    return %arg0, %c0_i32, %c0_i32_0 : i32, i32, i32
  }
  func.func @transform_1(%arg0: i32) -> (i32, i32) {
    %c0_i32 = arith.constant 0 : i32
    %c0_i32_0 = arith.constant 0 : i32
    %c0_i32_1 = arith.constant 0 : i32
    return %c0_i32, %c0_i32_0 : i32, i32
  }
  func.func @transform_2(%arg0: i32) -> (i32, i32) {
    %c0_i32 = arith.constant 0 : i32
    %c0_i32_0 = arith.constant 0 : i32
    %c0_i32_1 = arith.constant 0 : i32
    return %c0_i32, %c0_i32_0 : i32, i32
  }
  func.func @transform_3(%arg0: i32) -> (i32, i32, i32, i32) {
    %c0_i32 = arith.constant 0 : i32
    %c0_i32_0 = arith.constant 0 : i32
    %c0_i32_1 = arith.constant 0 : i32
    %c0_i32_2 = arith.constant 0 : i32
    return %arg0, %c0_i32, %c0_i32_0, %c0_i32_1 : i32, i32, i32, i32
  }
}

module attributes {stable_mosaic.version = 11 : i64} {
  func.func @_sconv2_kernel(%arg0: i32, %arg1: memref<1x4x72x196xf32, #tpu.memory_space<vmem>>, %arg2: memref<16x72xf32, #tpu.memory_space<vmem>>, %arg3: memref<16x1xf32, #tpu.memory_space<vmem>>, %arg4: memref<1x4x16x196xf32, #tpu.memory_space<vmem>>) attributes {dimension_semantics = [#tpu.dimension_semantics<parallel>], iteration_bounds = array<i64: 2>, scalar_prefetch = 0 : i64, scratch_operands = 0 : i64, tpu.core_type = #tpu.core_type<tc>, window_params = [{transform_indices = @transform_0, window_bounds = array<i64: 1, 4, 72, 196>}, {pipeline_mode = #tpu.pipeline_mode<synchronous>, transform_indices = @transform_1, window_bounds = array<i64: 16, 72>}, {pipeline_mode = #tpu.pipeline_mode<synchronous>, transform_indices = @transform_2, window_bounds = array<i64: 16, 1>}, {transform_indices = @transform_3, window_bounds = array<i64: 1, 4, 16, 196>}]} {
    %c0 = arith.constant 0 : index
    %c0_0 = arith.constant 0 : index
    %0 = vector.load %arg2[%c0, %c0_0] : memref<16x72xf32, #tpu.memory_space<vmem>>, vector<16x72xf32>
    %c0_1 = arith.constant 0 : index
    %c0_2 = arith.constant 0 : index
    %1 = vector.load %arg3[%c0_1, %c0_2] : memref<16x1xf32, #tpu.memory_space<vmem>>, vector<16x1xf32>
    %cst = arith.constant 0.000000e+00 : f32
    %2 = vector.broadcast %cst : f32 to vector<16x196xf32>
    %c0_3 = arith.constant 0 : index
    %c0_4 = arith.constant 0 : index
    %c0_5 = arith.constant 0 : index
    %c0_6 = arith.constant 0 : index
    %3 = vector.load %arg1[%c0_3, %c0_4, %c0_5, %c0_6] : memref<1x4x72x196xf32, #tpu.memory_space<vmem>>, vector<1x1x72x196xf32>
    %4 = vector.shape_cast %3 : vector<1x1x72x196xf32> to vector<72x196xf32>
    %cst_7 = arith.constant dense<0.000000e+00> : vector<16x196xf32>
    %5 = tpu.matmul %0, %4, %cst_7 {dimension_numbers = #tpu.dot_dimension_numbers<[1], [0], [0], [1], [0, 0, 1, 1], [], []>} : vector<16x72xf32>, vector<72x196xf32>, vector<16x196xf32> -> vector<16x196xf32>
    %6 = vector.broadcast %1 : vector<16x1xf32> to vector<16x196xf32>
    %7 = arith.addf %5, %6 : vector<16x196xf32>
    %cst_8 = arith.constant 5.000000e-01 : f32
    %8 = vector.broadcast %cst_8 : f32 to vector<16x196xf32>
    %9 = arith.mulf %2, %8 : vector<16x196xf32>
    %10 = arith.addf %9, %7 : vector<16x196xf32>
    %cst_9 = arith.constant 1.000000e+00 : f32
    %11 = vector.broadcast %cst_9 : f32 to vector<16x196xf32>
    %12 = arith.cmpf oge, %10, %11 : vector<16x196xf32>
    %13 = arith.extui %12 : vector<16x196xi1> to vector<16x196xi32>
    %14 = arith.sitofp %13 : vector<16x196xi32> to vector<16x196xf32>
    %c0_10 = arith.constant 0 : index
    %c0_11 = arith.constant 0 : index
    %c0_12 = arith.constant 0 : index
    %c0_13 = arith.constant 0 : index
    %15 = vector.load %arg4[%c0_10, %c0_11, %c0_12, %c0_13] : memref<1x4x16x196xf32, #tpu.memory_space<vmem>>, vector<1x1x16x196xf32>
    %16 = vector.shape_cast %15 : vector<1x1x16x196xf32> to vector<16x196xf32>
    %17 = vector.shape_cast %14 : vector<16x196xf32> to vector<1x1x16x196xf32>
    tpu.vector_store %arg4[%c0_10, %c0_11, %c0_12, %c0_13], %17 {strides = array<i32>} : memref<1x4x16x196xf32, #tpu.memory_space<vmem>>, vector<1x1x16x196xf32>,
    %cst_14 = arith.constant 1.000000e+00 : f32
    %18 = vector.broadcast %cst_14 : f32 to vector<16x196xf32>
    %19 = arith.subf %18, %14 : vector<16x196xf32>
    %20 = arith.mulf %19, %10 : vector<16x196xf32>
    %c0_15 = arith.constant 0 : index
    %c1 = arith.constant 1 : index
    %c0_16 = arith.constant 0 : index
    %c0_17 = arith.constant 0 : index
    %21 = vector.load %arg1[%c0_15, %c1, %c0_16, %c0_17] : memref<1x4x72x196xf32, #tpu.memory_space<vmem>>, vector<1x1x72x196xf32>
    %22 = vector.shape_cast %21 : vector<1x1x72x196xf32> to vector<72x196xf32>
    %cst_18 = arith.constant dense<0.000000e+00> : vector<16x196xf32>
    %23 = tpu.matmul %0, %22, %cst_18 {dimension_numbers = #tpu.dot_dimension_numbers<[1], [0], [0], [1], [0, 0, 1, 1], [], []>} : vector<16x72xf32>, vector<72x196xf32>, vector<16x196xf32> -> vector<16x196xf32>
    %24 = vector.broadcast %1 : vector<16x1xf32> to vector<16x196xf32>
    %25 = arith.addf %23, %24 : vector<16x196xf32>
    %cst_19 = arith.constant 5.000000e-01 : f32
    %26 = vector.broadcast %cst_19 : f32 to vector<16x196xf32>
    %27 = arith.mulf %20, %26 : vector<16x196xf32>
    %28 = arith.addf %27, %25 : vector<16x196xf32>
    %cst_20 = arith.constant 1.000000e+00 : f32
    %29 = vector.broadcast %cst_20 : f32 to vector<16x196xf32>
    %30 = arith.cmpf oge, %28, %29 : vector<16x196xf32>
    %31 = arith.extui %30 : vector<16x196xi1> to vector<16x196xi32>
    %32 = arith.sitofp %31 : vector<16x196xi32> to vector<16x196xf32>
    %c0_21 = arith.constant 0 : index
    %c1_22 = arith.constant 1 : index
    %c0_23 = arith.constant 0 : index
    %c0_24 = arith.constant 0 : index
    %33 = vector.load %arg4[%c0_21, %c1_22, %c0_23, %c0_24] : memref<1x4x16x196xf32, #tpu.memory_space<vmem>>, vector<1x1x16x196xf32>
    %34 = vector.shape_cast %33 : vector<1x1x16x196xf32> to vector<16x196xf32>
    %35 = vector.shape_cast %32 : vector<16x196xf32> to vector<1x1x16x196xf32>
    tpu.vector_store %arg4[%c0_21, %c1_22, %c0_23, %c0_24], %35 {strides = array<i32>} : memref<1x4x16x196xf32, #tpu.memory_space<vmem>>, vector<1x1x16x196xf32>,
    %cst_25 = arith.constant 1.000000e+00 : f32
    %36 = vector.broadcast %cst_25 : f32 to vector<16x196xf32>
    %37 = arith.subf %36, %32 : vector<16x196xf32>
    %38 = arith.mulf %37, %28 : vector<16x196xf32>
    %c0_26 = arith.constant 0 : index
    %c2 = arith.constant 2 : index
    %c0_27 = arith.constant 0 : index
    %c0_28 = arith.constant 0 : index
    %39 = vector.load %arg1[%c0_26, %c2, %c0_27, %c0_28] : memref<1x4x72x196xf32, #tpu.memory_space<vmem>>, vector<1x1x72x196xf32>
    %40 = vector.shape_cast %39 : vector<1x1x72x196xf32> to vector<72x196xf32>
    %cst_29 = arith.constant dense<0.000000e+00> : vector<16x196xf32>
    %41 = tpu.matmul %0, %40, %cst_29 {dimension_numbers = #tpu.dot_dimension_numbers<[1], [0], [0], [1], [0, 0, 1, 1], [], []>} : vector<16x72xf32>, vector<72x196xf32>, vector<16x196xf32> -> vector<16x196xf32>
    %42 = vector.broadcast %1 : vector<16x1xf32> to vector<16x196xf32>
    %43 = arith.addf %41, %42 : vector<16x196xf32>
    %cst_30 = arith.constant 5.000000e-01 : f32
    %44 = vector.broadcast %cst_30 : f32 to vector<16x196xf32>
    %45 = arith.mulf %38, %44 : vector<16x196xf32>
    %46 = arith.addf %45, %43 : vector<16x196xf32>
    %cst_31 = arith.constant 1.000000e+00 : f32
    %47 = vector.broadcast %cst_31 : f32 to vector<16x196xf32>
    %48 = arith.cmpf oge, %46, %47 : vector<16x196xf32>
    %49 = arith.extui %48 : vector<16x196xi1> to vector<16x196xi32>
    %50 = arith.sitofp %49 : vector<16x196xi32> to vector<16x196xf32>
    %c0_32 = arith.constant 0 : index
    %c2_33 = arith.constant 2 : index
    %c0_34 = arith.constant 0 : index
    %c0_35 = arith.constant 0 : index
    %51 = vector.load %arg4[%c0_32, %c2_33, %c0_34, %c0_35] : memref<1x4x16x196xf32, #tpu.memory_space<vmem>>, vector<1x1x16x196xf32>
    %52 = vector.shape_cast %51 : vector<1x1x16x196xf32> to vector<16x196xf32>
    %53 = vector.shape_cast %50 : vector<16x196xf32> to vector<1x1x16x196xf32>
    tpu.vector_store %arg4[%c0_32, %c2_33, %c0_34, %c0_35], %53 {strides = array<i32>} : memref<1x4x16x196xf32, #tpu.memory_space<vmem>>, vector<1x1x16x196xf32>,
    %cst_36 = arith.constant 1.000000e+00 : f32
    %54 = vector.broadcast %cst_36 : f32 to vector<16x196xf32>
    %55 = arith.subf %54, %50 : vector<16x196xf32>
    %56 = arith.mulf %55, %46 : vector<16x196xf32>
    %c0_37 = arith.constant 0 : index
    %c3 = arith.constant 3 : index
    %c0_38 = arith.constant 0 : index
    %c0_39 = arith.constant 0 : index
    %57 = vector.load %arg1[%c0_37, %c3, %c0_38, %c0_39] : memref<1x4x72x196xf32, #tpu.memory_space<vmem>>, vector<1x1x72x196xf32>
    %58 = vector.shape_cast %57 : vector<1x1x72x196xf32> to vector<72x196xf32>
    %cst_40 = arith.constant dense<0.000000e+00> : vector<16x196xf32>
    %59 = tpu.matmul %0, %58, %cst_40 {dimension_numbers = #tpu.dot_dimension_numbers<[1], [0], [0], [1], [0, 0, 1, 1], [], []>} : vector<16x72xf32>, vector<72x196xf32>, vector<16x196xf32> -> vector<16x196xf32>
    %60 = vector.broadcast %1 : vector<16x1xf32> to vector<16x196xf32>
    %61 = arith.addf %59, %60 : vector<16x196xf32>
    %cst_41 = arith.constant 5.000000e-01 : f32
    %62 = vector.broadcast %cst_41 : f32 to vector<16x196xf32>
    %63 = arith.mulf %56, %62 : vector<16x196xf32>
    %64 = arith.addf %63, %61 : vector<16x196xf32>
    %cst_42 = arith.constant 1.000000e+00 : f32
    %65 = vector.broadcast %cst_42 : f32 to vector<16x196xf32>
    %66 = arith.cmpf oge, %64, %65 : vector<16x196xf32>
    %67 = arith.extui %66 : vector<16x196xi1> to vector<16x196xi32>
    %68 = arith.sitofp %67 : vector<16x196xi32> to vector<16x196xf32>
    %c0_43 = arith.constant 0 : index
    %c3_44 = arith.constant 3 : index
    %c0_45 = arith.constant 0 : index
    %c0_46 = arith.constant 0 : index
    %69 = vector.load %arg4[%c0_43, %c3_44, %c0_45, %c0_46] : memref<1x4x16x196xf32, #tpu.memory_space<vmem>>, vector<1x1x16x196xf32>
    %70 = vector.shape_cast %69 : vector<1x1x16x196xf32> to vector<16x196xf32>
    %71 = vector.shape_cast %68 : vector<16x196xf32> to vector<1x1x16x196xf32>
    tpu.vector_store %arg4[%c0_43, %c3_44, %c0_45, %c0_46], %71 {strides = array<i32>} : memref<1x4x16x196xf32, #tpu.memory_space<vmem>>, vector<1x1x16x196xf32>,
    return
  }
  func.func @transform_0(%arg0: i32) -> (i32, i32, i32, i32) {
    %c0_i32 = arith.constant 0 : i32
    %c0_i32_0 = arith.constant 0 : i32
    %c0_i32_1 = arith.constant 0 : i32
    %c0_i32_2 = arith.constant 0 : i32
    return %arg0, %c0_i32, %c0_i32_0, %c0_i32_1 : i32, i32, i32, i32
  }
  func.func @transform_1(%arg0: i32) -> (i32, i32) {
    %c0_i32 = arith.constant 0 : i32
    %c0_i32_0 = arith.constant 0 : i32
    %c0_i32_1 = arith.constant 0 : i32
    return %c0_i32, %c0_i32_0 : i32, i32
  }
  func.func @transform_2(%arg0: i32) -> (i32, i32) {
    %c0_i32 = arith.constant 0 : i32
    %c0_i32_0 = arith.constant 0 : i32
    %c0_i32_1 = arith.constant 0 : i32
    return %c0_i32, %c0_i32_0 : i32, i32
  }
  func.func @transform_3(%arg0: i32) -> (i32, i32, i32, i32) {
    %c0_i32 = arith.constant 0 : i32
    %c0_i32_0 = arith.constant 0 : i32
    %c0_i32_1 = arith.constant 0 : i32
    %c0_i32_2 = arith.constant 0 : i32
    return %arg0, %c0_i32, %c0_i32_0, %c0_i32_1 : i32, i32, i32, i32
  }
}

</mosaic_0001>

<bundles_post_ra>
// kernel: vggsnn_mini_forward.2
= control target key start
LH: loop header
LB: loop body
LE: loop exit
PB: predicated region body
PF: predicated region fallthrough
CT: control target
= control target key end

     0   :  { %8 = vsyncpa [#allocation3], 0  ;;  %s810_s12 = smov 0   ;;  %s978_s0 = inlined_call_operand.vmem [shape: f32[2,9,784], index: 0, kind: input, shape index: {}]   ;;  %s979_s1 = inlined_call_operand.hbm [shape: f32[8,9], index: 1, kind: input, shape index: {}]   ;;  %s980_s2 = inlined_call_operand.vmem [shape: f32[8,1], index: 2, kind: input, shape index: {}]   ;;  %s981_s3 = inlined_call_operand.vmem [shape: f32[2,4,8,784], index: 3, kind: output, shape index: {}]  }
   0x1 LB: > { %s647_s13 = sadd.s32 4294967295, %s785_s12   ;;  %p649_p0 = scmp.ge.s32.totalorder %s785_s12, 1  ;;  %s785_s12 = sphi %s810_s12, %s14_s12  }
   0x2   : > { %p113_p1 = scmp.lt.s32.totalorder %s785_s12, 3  ;;  %s125_s16 = sshll.u32 %s979_s1, 4  ;;  %s126_s16 = int_to_ptr.hbm [resolvable:$true] %s125_s16 }
   0x3   : > { %p731_p3 = scmp.eq.s32.totalorder %s647_s13, 0  ;;  %s787_s17 = smov [#allocation2]  }
   0x4   : > { %p114_p2 = pnand %p649_p0, %p113_p1  ;;  %s127_s18 = sshll.u32 %s787_s17, 4  ;;  %s128_s18 = int_to_ptr.vmem [resolvable:$true] %s127_s18 }
   0x6   : > { %p727_p4 = pneg %p114_p2  ;;  %151 = sbr.rel (%p114_p2) target bundleno = 207 (0xcf), region = 32 }
   0x8   : > { %p728_p5 = pnand %p731_p3, %p727_p4 }
   0xa   : > { %730 = dma.hbm_to_vmem [thread:$0]  (!%p728_p5), %s126_s16, 128, %s128_s18, [#allocation3]  }
   0xb   : > { %780 = dma.done.wait (%p731_p3), [#allocation3], 128  }
   0xc   : > { %782 = vsyncadd (%p731_p3), [#allocation3], 4294967168  ;;  %p176_p6 = scmp.lt.s32.totalorder %s647_s13, 1  ;;  %v788_v0 = vmov 0   ;;  %vm211_vm0 = vcmask 1040384   ;;  %v186_v9 = vld [vmem:[#allocation2] sm:$0xff] }
   0xd   : > { %744 = vset.pattern.permute.xlu0 %v788_v0  ;;  %vm207_vm1 = vcmask 72704   ;;  %v201_v13 = vld [vmem:[%s980_s2] sm:$0xff]  ;;  %v789_v22 = vmov 0.0   ;;  %vm407_vm11 = vcmask 130048  }
   0xe   : > { %s983_s13 = smov (!%p176_p6, %s647_s13), 1  ;;  %204 = vperm.xlu0 %744, %v201_v13  }
   0xf   : > { %s721_s19 = smul.u32 112, %s983_s13 }
  0x10   : > { %s722_s25 = smul.u32 224, %s983_s13 }
  0x11   : > { %s827_s22 = scalar_lea.vmem %s978_s0, %s721_s19 }
  0x12   : > { %v194_v1 = vld [vmem:[%s827_s22 + $0x38] sm:$0x1]  ;;  %v195_v2 = vld [vmem:[%s827_s22 + $0x40] sm:$0x1]  ;;  %v196_v3 = vld [vmem:[%s827_s22 + $0x48] sm:$0x1]  ;;  %s868_s28 = scalar_lea.vmem %s981_s3, %s722_s25 }
  0x13   : > { %656 = vmatpush.msk.msra.mxu0 %vm211_vm0, %v194_v1  ;;  %658 = vmatpush.msk.msra.mxu1 %vm211_vm0, %v195_v2  ;;  %v197_v4 = vld [vmem:[%s827_s22 + $0x50] sm:$0x1]  ;;  %v187_v5 = vld [vmem:[%s827_s22] sm:$0xff]  ;;  %v188_v6 = vld [vmem:[%s827_s22 + $0x8] sm:$0xff] }
  0x14   : > { %660 = vmatpush.msk.msra.mxu2 %vm211_vm0, %v196_v3  ;;  %662 = vmatpush.msk.msra.mxu3 %vm211_vm0, %v197_v4  ;;  %v189_v7 = vld [vmem:[%s827_s22 + $0x10] sm:$0xff]  ;;  %v190_v8 = vld [vmem:[%s827_s22 + $0x18] sm:$0xff]  ;;  %v200_v10 = vld [vmem:[%s827_s22 + $0x68] sm:$0x1] }
  0x15   : > { %248 = vmatpush.msra.mxu0 %v187_v5  ;;  %268 = vmatpush.msra.mxu1 %v188_v6  ;;  %v198_v11 = vld [vmem:[%s827_s22 + $0x58] sm:$0x1]  ;;  %v199_v12 = vld [vmem:[%s827_s22 + $0x60] sm:$0x1]  ;;  %v193_v14 = vld [vmem:[%s827_s22 + $0x30] sm:$0xff] }
  0x16   : > { %288 = vmatpush.msra.mxu2 %v189_v7  ;;  %308 = vmatpush.msra.mxu3 %v190_v8  ;;  %v191_v15 = vld [vmem:[%s827_s22 + $0x20] sm:$0xff]  ;;  %v192_v16 = vld [vmem:[%s827_s22 + $0x28] sm:$0xff] }
  0x17   : > { %657 = vmatmul.msk.f32.vlgmr.msra.gmra.mxu0 %vm207_vm1, %v186_v9  ;;  %659 = vmatmul.msk.f32.vlgmr.msra.gmra.mxu1 %vm207_vm1, %v186_v9 }
  0x18   : > { %661 = vmatmul.msk.f32.vlgmr.msra.gmra.mxu2 %vm207_vm1, %v186_v9  ;;  %663 = vmatmul.msk.f32.vlgmr.msra.gmra.mxu3 %vm207_vm1, %v186_v9 }
  0x19   : > { %668 = vmatpush.msk.msrb.mxu2 %vm211_vm0, %v200_v10  ;;  %664 = vmatpush.msk.msrb.mxu0 %vm211_vm0, %v198_v11 }
  0x1a   : > { %666 = vmatpush.msk.msrb.mxu1 %vm211_vm0, %v199_v12 }
  0x1b   : > { %368 = vmatpush.msrb.mxu2 %v193_v14  ;;  %328 = vmatpush.msrb.mxu0 %v191_v15 }
  0x1c   : > { %348 = vmatpush.msrb.mxu1 %v192_v16 }
  0x1f   : > { %665 = vmatmul.msk.f32.vlgmr.msrb.gmra.mxu0 %vm207_vm1, %v186_v9  ;;  %667 = vmatmul.msk.f32.vlgmr.msrb.gmra.mxu1 %vm207_vm1, %v186_v9 }
  0x20   : > { %669 = vmatmul.msk.f32.vlgmr.msrb.gmra.mxu2 %vm207_vm1, %v186_v9 }
  0x80   : > { %v205_v17 = vpop.permute.xlu0 %204 }
  0x94   : > { %v250_v18 = vpop.f32.mrf.mxu0  ;;  %v270_v19 = vpop.f32.mrf.mxu1 }
  0x95   : > { %v861_v20 = vadd.f32 %v250_v18, %v205_v17  ;;  %v863_v21 = vadd.f32 %v270_v19, %v205_v17 }
  0x97   : > { %vm380_vm2 = vcmp.ge.f32.partialorder %v861_v20, 1.0  ;;  %vm381_vm3 = vcmp.ge.f32.partialorder %v863_v21, 1.0 }
  0x98   : > { %v670_v23 = vsel %vm380_vm2, 1.0, %v789_v22  ;;  %v671_v24 = vsel %vm381_vm3, 1.0, %v789_v22 }
  0x99   : > { %401 = vst [vmem:[%s868_s28] sm:$0xff] %v670_v23  ;;  %v409_v25 = vsub.f32 1.0, %v670_v23  ;;  %v410_v26 = vsub.f32 1.0, %v671_v24 }
  0x9a   : > { %402 = vst [vmem:[%s868_s28 + $0x8] sm:$0xff] %v671_v24 }
  0x9b   : > { %v416_v27 = vmul.f32 %v409_v25, %v861_v20  ;;  %v417_v28 = vmul.f32 %v410_v26, %v863_v21  ;;  %v290_v29 = vpop.f32.mrf.mxu2  ;;  %v310_v30 = vpop.f32.mrf.mxu3 }
  0x9c   : > { %v878_v31 = vadd.f32 %v290_v29, %v205_v17  ;;  %v880_v32 = vadd.f32 %v310_v30, %v205_v17  ;;  %v330_v33 = vpop.f32.mrf.mxu0  ;;  %v350_v34 = vpop.f32.mrf.mxu1 }
  0x9d   : > { %v423_v35 = vmul.f32 0.5, %v416_v27  ;;  %v424_v36 = vmul.f32 0.5, %v417_v28  ;;  %v882_v37 = vadd.f32 %v330_v33, %v205_v17  ;;  %v884_v38 = vadd.f32 %v350_v34, %v205_v17 }
  0x9e   : > { %vm382_vm4 = vcmp.ge.f32.partialorder %v878_v31, 1.0  ;;  %vm383_vm5 = vcmp.ge.f32.partialorder %v880_v32, 1.0 }
  0x9f   : > { %v430_v39 = vadd.f32 %v423_v35, %v861_v20  ;;  %v431_v40 = vadd.f32 %v424_v36, %v863_v21  ;;  %v672_v41 = vsel %vm382_vm4, 1.0, %v789_v22  ;;  %v673_v42 = vsel %vm383_vm5, 1.0, %v789_v22 }
  0xa0   : > { %403 = vst [vmem:[%s868_s28 + $0x10] sm:$0xff] %v672_v41  ;;  %v411_v43 = vsub.f32 1.0, %v672_v41  ;;  %v412_v44 = vsub.f32 1.0, %v673_v42  ;;  %vm384_vm6 = vcmp.ge.f32.partialorder %v882_v37, 1.0  ;;  %vm385_vm7 = vcmp.ge.f32.partialorder %v884_v38, 1.0 }
  0xa1   : > { %vm437_vm8 = vcmp.ge.f32.partialorder %v430_v39, 1.0  ;;  %vm438_vm9 = vcmp.ge.f32.partialorder %v431_v40, 1.0  ;;  %404 = vst [vmem:[%s868_s28 + $0x18] sm:$0xff] %v673_v42  ;;  %v674_v45 = vsel %vm384_vm6, 1.0, %v789_v22  ;;  %v675_v46 = vsel %vm385_vm7, 1.0, %v789_v22 }
  0xa2   : > { %v677_v47 = vsel %vm437_vm8, 1.0, %v789_v22  ;;  %v678_v48 = vsel %vm438_vm9, 1.0, %v789_v22  ;;  %v418_v49 = vmul.f32 %v411_v43, %v878_v31  ;;  %v419_v50 = vmul.f32 %v412_v44, %v880_v32  ;;  %405 = vst [vmem:[%s868_s28 + $0x20] sm:$0xff] %v674_v45 }
  0xa3   : > { %684 = vst [vmem:[%s868_s28 + $0x38] sm:$0xff] %v677_v47  ;;  %v466_v51 = vsub.f32 1.0, %v677_v47  ;;  %v467_v52 = vsub.f32 1.0, %v678_v48  ;;  %v413_v53 = vsub.f32 1.0, %v674_v45  ;;  %v414_v54 = vsub.f32 1.0, %v675_v46  ;;  %v370_v55 = vpop.f32.mrf.mxu2 }
  0xa4   : > { %685 = vst [vmem:[%s868_s28 + $0x40] sm:$0xff] %v678_v48  ;;  %v425_v56 = vmul.f32 0.5, %v418_v49  ;;  %v426_v57 = vmul.f32 0.5, %v419_v50  ;;  %v905_v58 = vadd.f32 %v370_v55, %v205_v17 }
  0xa5   : > { %v473_v59 = vmul.f32 %v466_v51, %v430_v39  ;;  %v474_v60 = vmul.f32 %v467_v52, %v431_v40  ;;  %v420_v61 = vmul.f32 %v413_v53, %v882_v37  ;;  %406 = vst [vmem:[%s868_s28 + $0x28] sm:$0xff] %v675_v46  ;;  %v421_v62 = vmul.f32 %v414_v54, %v884_v38 }
  0xa6   : > { %v432_v63 = vadd.f32 %v425_v56, %v878_v31  ;;  %v433_v0 = vadd.f32 %v426_v57, %v880_v32  ;;  %vm386_vm10 = vcmp.ge.f32.partialorder %v905_v58, 1.0 }
  0xa7   : > { %v480_v1 = vmul.f32 0.5, %v473_v59  ;;  %v481_v2 = vmul.f32 0.5, %v474_v60  ;;  %v427_v3 = vmul.f32 0.5, %v420_v61  ;;  %v428_v4 = vmul.f32 0.5, %v421_v62 }
  0xa8   : > { %vm439_vm12 = vcmp.ge.f32.partialorder %v432_v63, 1.0  ;;  %vm440_vm13 = vcmp.ge.f32.partialorder %v433_v0, 1.0  ;;  %v676_v5 = vsel %vm386_vm10, 1.0, %v789_v22 }
  0xa9   : > { %v487_v6 = vadd.f32 %v480_v1, %v861_v20  ;;  %v488_v7 = vadd.f32 %v481_v2, %v863_v21  ;;  %v679_v8 = vsel %vm439_vm12, 1.0, %v789_v22  ;;  %v680_v9 = vsel %vm440_vm13, 1.0, %v789_v22  ;;  %408 = vst.msk [vmem:[%s868_s28 + $0x30] sm:$0xff] %vm407_vm11, %v676_v5 }
  0xaa   : > { %686 = vst [vmem:[%s868_s28 + $0x48] sm:$0xff] %v679_v8  ;;  %v468_v10 = vsub.f32 1.0, %v679_v8  ;;  %v469_v11 = vsub.f32 1.0, %v680_v9  ;;  %v434_v12 = vadd.f32 %v427_v3, %v882_v37  ;;  %v435_v13 = vadd.f32 %v428_v4, %v884_v38 }
  0xab   : > { %vm494_vm14 = vcmp.ge.f32.partialorder %v487_v6, 1.0  ;;  %vm495_vm15 = vcmp.ge.f32.partialorder %v488_v7, 1.0  ;;  %687 = vst [vmem:[%s868_s28 + $0x50] sm:$0xff] %v680_v9  ;;  %v415_v14 = vsub.f32 1.0, %v676_v5 }
  0xac   : > { %v691_v15 = vsel %vm494_vm14, 1.0, %v789_v22  ;;  %v692_v16 = vsel %vm495_vm15, 1.0, %v789_v22  ;;  %v475_v17 = vmul.f32 %v468_v10, %v432_v63  ;;  %v476_v18 = vmul.f32 %v469_v11, %v433_v0 }
  0xad   : > { %698 = vst [vmem:[%s868_s28 + $0x70] sm:$0xff] %v691_v15  ;;  %v523_v19 = vsub.f32 1.0, %v691_v15  ;;  %v524_v23 = vsub.f32 1.0, %v692_v16  ;;  %vm441_vm0 = vcmp.ge.f32.partialorder %v434_v12, 1.0  ;;  %vm442_vm1 = vcmp.ge.f32.partialorder %v435_v13, 1.0 }
  0xae   : > { %699 = vst [vmem:[%s868_s28 + $0x78] sm:$0xff] %v692_v16  ;;  %v482_v24 = vmul.f32 0.5, %v475_v17  ;;  %v483_v25 = vmul.f32 0.5, %v476_v18  ;;  %v681_v26 = vsel %vm441_vm0, 1.0, %v789_v22  ;;  %v682_v27 = vsel %vm442_vm1, 1.0, %v789_v22 }
  0xaf   : > { %v530_v28 = vmul.f32 %v523_v19, %v487_v6  ;;  %v531_v29 = vmul.f32 %v524_v23, %v488_v7  ;;  %688 = vst [vmem:[%s868_s28 + $0x58] sm:$0xff] %v681_v26  ;;  %v470_v30 = vsub.f32 1.0, %v681_v26  ;;  %v471_v33 = vsub.f32 1.0, %v682_v27 }
  0xb0   : > { %v489_v34 = vadd.f32 %v482_v24, %v878_v31  ;;  %v490_v35 = vadd.f32 %v483_v25, %v880_v32  ;;  %689 = vst [vmem:[%s868_s28 + $0x60] sm:$0xff] %v682_v27  ;;  %v422_v36 = vmul.f32 %v415_v14, %v905_v58 }
  0xb1   : > { %v537_v39 = vmul.f32 0.5, %v530_v28  ;;  %v538_v40 = vmul.f32 0.5, %v531_v29  ;;  %v477_v41 = vmul.f32 %v470_v30, %v434_v12  ;;  %v478_v42 = vmul.f32 %v471_v33, %v435_v13 }
  0xb2   : > { %vm496_vm2 = vcmp.ge.f32.partialorder %v489_v34, 1.0  ;;  %vm497_vm3 = vcmp.ge.f32.partialorder %v490_v35, 1.0  ;;  %v429_v43 = vmul.f32 0.5, %v422_v36 }
  0xb3   : > { %v544_v44 = vadd.f32 %v537_v39, %v861_v20  ;;  %v545_v45 = vadd.f32 %v538_v40, %v863_v21  ;;  %v693_v46 = vsel %vm496_vm2, 1.0, %v789_v22  ;;  %v694_v47 = vsel %vm497_vm3, 1.0, %v789_v22 }
  0xb4   : > { %700 = vst [vmem:[%s868_s28 + $0x80] sm:$0xff] %v693_v46  ;;  %v525_v48 = vsub.f32 1.0, %v693_v46  ;;  %v526_v49 = vsub.f32 1.0, %v694_v47  ;;  %v484_v50 = vmul.f32 0.5, %v477_v41  ;;  %v485_v51 = vmul.f32 0.5, %v478_v42 }
  0xb5   : > { %vm551_vm4 = vcmp.ge.f32.partialorder %v544_v44, 1.0  ;;  %vm552_vm5 = vcmp.ge.f32.partialorder %v545_v45, 1.0  ;;  %701 = vst [vmem:[%s868_s28 + $0x88] sm:$0xff] %v694_v47  ;;  %v436_v52 = vadd.f32 %v429_v43, %v905_v58 }
  0xb6   : > { %v705_v20 = vsel %vm551_vm4, 1.0, %v789_v22  ;;  %v706_v21 = vsel %vm552_vm5, 1.0, %v789_v22  ;;  %v532_v53 = vmul.f32 %v525_v48, %v489_v34  ;;  %v533_v54 = vmul.f32 %v526_v49, %v490_v35 }
  0xb7   : > { %712 = vst [vmem:[%s868_s28 + $0xa8] sm:$0xff] %v705_v20  ;;  %v491_v55 = vadd.f32 %v484_v50, %v882_v37  ;;  %v492_v56 = vadd.f32 %v485_v51, %v884_v38  ;;  %vm443_vm6 = vcmp.ge.f32.partialorder %v436_v52, 1.0 }
  0xb8   : > { %713 = vst [vmem:[%s868_s28 + $0xb0] sm:$0xff] %v706_v21  ;;  %v539_v57 = vmul.f32 0.5, %v532_v53  ;;  %v540_v59 = vmul.f32 0.5, %v533_v54  ;;  %v683_v60 = vsel %vm443_vm6, 1.0, %v789_v22 }
  0xb9   : > { %vm498_vm7 = vcmp.ge.f32.partialorder %v491_v55, 1.0  ;;  %vm499_vm8 = vcmp.ge.f32.partialorder %v492_v56, 1.0  ;;  %690 = vst.msk [vmem:[%s868_s28 + $0x68] sm:$0xff] %vm407_vm11, %v683_v60  ;;  %v472_v61 = vsub.f32 1.0, %v683_v60 }
  0xba   : > { %v546_v62 = vadd.f32 %v539_v57, %v878_v31  ;;  %v547_v63 = vadd.f32 %v540_v59, %v880_v32  ;;  %v695_v0 = vsel %vm498_vm7, 1.0, %v789_v22  ;;  %v696_v1 = vsel %vm499_vm8, 1.0, %v789_v22 }
  0xbb   : > { %702 = vst [vmem:[%s868_s28 + $0x90] sm:$0xff] %v695_v0  ;;  %v527_v2 = vsub.f32 1.0, %v695_v0  ;;  %v528_v3 = vsub.f32 1.0, %v696_v1  ;;  %v479_v4 = vmul.f32 %v472_v61, %v436_v52 }
  0xbc   : > { %vm553_vm9 = vcmp.ge.f32.partialorder %v546_v62, 1.0  ;;  %vm554_vm10 = vcmp.ge.f32.partialorder %v547_v63, 1.0  ;;  %703 = vst [vmem:[%s868_s28 + $0x98] sm:$0xff] %v696_v1 }
  0xbd   : > { %v707_v5 = vsel %vm553_vm9, 1.0, %v789_v22  ;;  %v708_v6 = vsel %vm554_vm10, 1.0, %v789_v22  ;;  %v534_v7 = vmul.f32 %v527_v2, %v491_v55  ;;  %v535_v31 = vmul.f32 %v528_v3, %v492_v56 }
  0xbe   : > { %714 = vst [vmem:[%s868_s28 + $0xb8] sm:$0xff] %v707_v5  ;;  %v486_v32 = vmul.f32 0.5, %v479_v4 }
  0xbf   : > { %715 = vst [vmem:[%s868_s28 + $0xc0] sm:$0xff] %v708_v6  ;;  %v541_v8 = vmul.f32 0.5, %v534_v7  ;;  %v542_v9 = vmul.f32 0.5, %v535_v31 }
  0xc0   : > { %v493_v10 = vadd.f32 %v486_v32, %v905_v58 }
  0xc1   : > { %v548_v11 = vadd.f32 %v541_v8, %v882_v37  ;;  %v549_v12 = vadd.f32 %v542_v9, %v884_v38 }
  0xc2   : > { %vm500_vm12 = vcmp.ge.f32.partialorder %v493_v10, 1.0 }
  0xc3   : > { %vm555_vm13 = vcmp.ge.f32.partialorder %v548_v11, 1.0  ;;  %vm556_vm14 = vcmp.ge.f32.partialorder %v549_v12, 1.0  ;;  %v697_v13 = vsel %vm500_vm12, 1.0, %v789_v22 }
  0xc4   : > { %v709_v14 = vsel %vm555_vm13, 1.0, %v789_v22  ;;  %v710_v15 = vsel %vm556_vm14, 1.0, %v789_v22  ;;  %704 = vst.msk [vmem:[%s868_s28 + $0xa0] sm:$0xff] %vm407_vm11, %v697_v13  ;;  %v529_v16 = vsub.f32 1.0, %v697_v13 }
  0xc5   : > { %716 = vst [vmem:[%s868_s28 + $0xc8] sm:$0xff] %v709_v14 }
  0xc6   : > { %717 = vst [vmem:[%s868_s28 + $0xd0] sm:$0xff] %v710_v15  ;;  %v536_v17 = vmul.f32 %v529_v16, %v493_v10 }
  0xc8   : > { %v543_v18 = vmul.f32 0.5, %v536_v17 }
  0xca   : > { %v550_v37 = vadd.f32 %v543_v18, %v905_v58 }
  0xcc   : > { %vm557_vm15 = vcmp.ge.f32.partialorder %v550_v37, 1.0 }
  0xcd   : > { %v711_v38 = vsel %vm557_vm15, 1.0, %v789_v22 }
  0xce   : > { %718 = vst.msk [vmem:[%s868_s28 + $0xd8] sm:$0xff] %vm407_vm11, %v711_v38 }
  0xcf PF: > { %s14_s12 = sadd.s32 1, %s785_s12  }
  0xd0   : > { %p11_p7 = scmp.ge.s32.totalorder %s14_s12, 4  }
  0xd2   :  { %13 = sbr.rel (!%p11_p7) target bundleno = 1 (0x1), region = 70 }
  0xd7   :  { %601 = vsyncpa [#allocation3], 1 }
  0xd8   :  { %603 = vsyncpa [#allocation3 + $0x1], 1 }

// kernel: vggsnn_mini_forward.3
= control target key start
LH: loop header
LB: loop body
LE: loop exit
PB: predicated region body
PF: predicated region fallthrough
CT: control target
= control target key end

     0   :  { %s777_s12 = smov 0   ;;  %s972_s0 = inlined_call_operand.vmem [shape: f32[2,4,72,196], index: 0, kind: input, shape index: {}]   ;;  %s973_s1 = inlined_call_operand.vmem [shape: f32[16,72], index: 1, kind: input, shape index: {}]   ;;  %s974_s2 = inlined_call_operand.vmem [shape: f32[16,1], index: 2, kind: input, shape index: {}]   ;;  %s975_s3 = inlined_call_operand.vmem [shape: f32[2,4,16,196], index: 3, kind: output, shape index: {}]  }
   0x1 LB: > { %s626_s13 = sadd.s32 4294967295, %s753_s12   ;;  %p630_p0 = scmp.ge.s32.totalorder %s753_s12, 1  ;;  %s753_s12 = sphi %s777_s12, %s13_s12  }
   0x2   : > { %p137_p1 = scmp.lt.s32.totalorder %s753_s12, 3 }
   0x4   : > { %p138_p2 = pnand %p630_p0, %p137_p1 }
   0x5   : > { %p161_p3 = scmp.lt.s32.totalorder (!%p138_p2), %s626_s13, 1 }
   0x6   : > { %141 = sbr.rel (%p138_p2) target bundleno = 208 (0xd0), region = 32 }
   0xb   : > { %v173_v0 = vld [vmem:[%s974_s2] sm:$0xff]  ;;  %v755_v1 = vmov 0   ;;  %s977_s13 = smov (!%p161_p3, %s626_s13), 1  ;;  %vm203_vm0 = vcmask 588800   ;;  %v172_v55 = vld [vmem:[%s973_s1 + $0x8] sm:$0xff]  ;;  %vm273_vm3 = vcmask 556032  }
   0xc   : > { %746 = vset.pattern.permute.xlu0 %v755_v1  ;;  %s735_s16 = smul.u32 576, %s977_s13  ;;  %v835_v38 = vld [vmem:[%s973_s1] sm:$0xff]  ;;  %s734_s26 = sshll.u32 %s977_s13, 7 }
   0xd   : > { %195 = vperm.xlu0 %746, %v173_v0   ;;  %v174_v0 = vld [vmem:[%s974_s2 + $0x8] sm:$0xff]  ;;  %s911_s29 = scalar_lea.vmem %s975_s3, %s734_s26 }
   0xe   : > { %s794_s19 = scalar_lea.vmem %s972_s0, %s735_s16 }
   0xf   : > { %v191_v2 = vld [vmem:[%s794_s19 + $0x80] sm:$0xff]  ;;  %v192_v3 = vld [vmem:[%s794_s19 + $0x88] sm:$0xff]  ;;  %v658_v4 = vld [vmem:[%s794_s19 + $0x110] sm:$0xff] }
  0x10   : > { %217 = vmatpush.msra.mxu0 %v191_v2  ;;  %240 = vmatpush.msra.mxu1 %v192_v3  ;;  %v659_v5 = vld [vmem:[%s794_s19 + $0x118] sm:$0xff]  ;;  %v189_v6 = vld [vmem:[%s794_s19 + $0x70] sm:$0xff]  ;;  %v656_v8 = vld [vmem:[%s794_s19 + $0x100] sm:$0xff] }
  0x11   : > { %v190_v7 = vld [vmem:[%s794_s19 + $0x78] sm:$0xff]  ;;  %311 = vmatpush.msra.mxu2 %v658_v4  ;;  %334 = vmatpush.msra.mxu3 %v659_v5  ;;  %v657_v9 = vld [vmem:[%s794_s19 + $0x108] sm:$0xff]  ;;  %v187_v10 = vld [vmem:[%s794_s19 + $0x60] sm:$0xff] }
  0x12   : > { %218 = vmatpush.msra.mxu0 %v189_v6  ;;  %241 = vmatpush.msra.mxu1 %v190_v7  ;;  %v188_v11 = vld [vmem:[%s794_s19 + $0x68] sm:$0xff]  ;;  %v654_v12 = vld [vmem:[%s794_s19 + $0xf0] sm:$0xff]  ;;  %v655_v13 = vld [vmem:[%s794_s19 + $0xf8] sm:$0xff] }
  0x13   : > { %312 = vmatpush.msra.mxu2 %v656_v8  ;;  %335 = vmatpush.msra.mxu3 %v657_v9  ;;  %v185_v14 = vld [vmem:[%s794_s19 + $0x50] sm:$0xff]  ;;  %v186_v15 = vld [vmem:[%s794_s19 + $0x58] sm:$0xff]  ;;  %v652_v16 = vld [vmem:[%s794_s19 + $0xe0] sm:$0xff] }
  0x14   : > { %219 = vmatpush.msra.mxu0 %v187_v10  ;;  %242 = vmatpush.msra.mxu1 %v188_v11  ;;  %v653_v17 = vld [vmem:[%s794_s19 + $0xe8] sm:$0xff]  ;;  %v183_v18 = vld [vmem:[%s794_s19 + $0x40] sm:$0xff]  ;;  %v650_v20 = vld [vmem:[%s794_s19 + $0xd0] sm:$0xff] }
  0x15   : > { %313 = vmatpush.msra.mxu2 %v654_v12  ;;  %336 = vmatpush.msra.mxu3 %v655_v13  ;;  %v184_v19 = vld [vmem:[%s794_s19 + $0x48] sm:$0xff]  ;;  %v651_v21 = vld [vmem:[%s794_s19 + $0xd8] sm:$0xff]  ;;  %v181_v22 = vld [vmem:[%s794_s19 + $0x30] sm:$0xff] }
  0x16   : > { %220 = vmatpush.msra.mxu0 %v185_v14  ;;  %243 = vmatpush.msra.mxu1 %v186_v15  ;;  %v182_v23 = vld [vmem:[%s794_s19 + $0x38] sm:$0xff]  ;;  %v648_v24 = vld [vmem:[%s794_s19 + $0xc0] sm:$0xff]  ;;  %v649_v25 = vld [vmem:[%s794_s19 + $0xc8] sm:$0xff] }
  0x17   : > { %314 = vmatpush.msra.mxu2 %v652_v16  ;;  %337 = vmatpush.msra.mxu3 %v653_v17  ;;  %v179_v26 = vld [vmem:[%s794_s19 + $0x20] sm:$0xff]  ;;  %v180_v27 = vld [vmem:[%s794_s19 + $0x28] sm:$0xff]  ;;  %v646_v28 = vld [vmem:[%s794_s19 + $0xb0] sm:$0xff] }
  0x18   : > { %221 = vmatpush.msra.mxu0 %v183_v18  ;;  %244 = vmatpush.msra.mxu1 %v184_v19  ;;  %v647_v29 = vld [vmem:[%s794_s19 + $0xb8] sm:$0xff]  ;;  %v177_v30 = vld [vmem:[%s794_s19 + $0x10] sm:$0xff]  ;;  %v644_v32 = vld [vmem:[%s794_s19 + $0xa0] sm:$0xff]  ;;  %v756_v18 = vmov 0.0  }
  0x19   : > { %315 = vmatpush.msra.mxu2 %v650_v20  ;;  %338 = vmatpush.msra.mxu3 %v651_v21  ;;  %v178_v31 = vld [vmem:[%s794_s19 + $0x18] sm:$0xff]  ;;  %v645_v33 = vld [vmem:[%s794_s19 + $0xa8] sm:$0xff]  ;;  %v175_v34 = vld [vmem:[%s794_s19] sm:$0xff] }
  0x1a   : > { %222 = vmatpush.msra.mxu0 %v181_v22  ;;  %245 = vmatpush.msra.mxu1 %v182_v23  ;;  %v176_v35 = vld [vmem:[%s794_s19 + $0x8] sm:$0xff]  ;;  %v642_v36 = vld [vmem:[%s794_s19 + $0x90] sm:$0xff]  ;;  %v643_v37 = vld [vmem:[%s794_s19 + $0x98] sm:$0xff] }
  0x1b   : > { %316 = vmatpush.msra.mxu2 %v648_v24  ;;  %339 = vmatpush.msra.mxu3 %v649_v25  ;;  %v688_v39 = vld [vmem:[%s794_s19 + $0x1a0] sm:$0xff]  ;;  %v689_v40 = vld [vmem:[%s794_s19 + $0x1a8] sm:$0xff]  ;;  %v718_v41 = vld [vmem:[%s794_s19 + $0x230] sm:$0xff] }
  0x1c   : > { %223 = vmatpush.msra.mxu0 %v179_v26  ;;  %246 = vmatpush.msra.mxu1 %v180_v27  ;;  %v719_v42 = vld [vmem:[%s794_s19 + $0x238] sm:$0xff]  ;;  %v686_v43 = vld [vmem:[%s794_s19 + $0x190] sm:$0xff]  ;;  %v716_v45 = vld [vmem:[%s794_s19 + $0x220] sm:$0xff] }
  0x1d   : > { %317 = vmatpush.msra.mxu2 %v646_v28  ;;  %340 = vmatpush.msra.mxu3 %v647_v29  ;;  %v687_v44 = vld [vmem:[%s794_s19 + $0x198] sm:$0xff]  ;;  %v717_v46 = vld [vmem:[%s794_s19 + $0x228] sm:$0xff]  ;;  %v684_v47 = vld [vmem:[%s794_s19 + $0x180] sm:$0xff] }
  0x1e   : > { %224 = vmatpush.msra.mxu0 %v177_v30  ;;  %247 = vmatpush.msra.mxu1 %v178_v31  ;;  %v685_v48 = vld [vmem:[%s794_s19 + $0x188] sm:$0xff]  ;;  %v714_v49 = vld [vmem:[%s794_s19 + $0x210] sm:$0xff]  ;;  %v715_v50 = vld [vmem:[%s794_s19 + $0x218] sm:$0xff] }
  0x1f   : > { %318 = vmatpush.msra.mxu2 %v644_v32  ;;  %341 = vmatpush.msra.mxu3 %v645_v33  ;;  %v682_v51 = vld [vmem:[%s794_s19 + $0x170] sm:$0xff]  ;;  %v683_v52 = vld [vmem:[%s794_s19 + $0x178] sm:$0xff]  ;;  %v712_v53 = vld [vmem:[%s794_s19 + $0x200] sm:$0xff] }
  0x20   : > { %225 = vmatpush.msra.mxu0 %v175_v34  ;;  %248 = vmatpush.msra.mxu1 %v176_v35  ;;  %v713_v54 = vld [vmem:[%s794_s19 + $0x208] sm:$0xff]  ;;  %v680_v56 = vld [vmem:[%s794_s19 + $0x160] sm:$0xff]  ;;  %v710_v58 = vld [vmem:[%s794_s19 + $0x1f0] sm:$0xff] }
  0x21   : > { %319 = vmatpush.msra.mxu2 %v642_v36  ;;  %342 = vmatpush.msra.mxu3 %v643_v37  ;;  %v681_v57 = vld [vmem:[%s794_s19 + $0x168] sm:$0xff]  ;;  %v711_v59 = vld [vmem:[%s794_s19 + $0x1f8] sm:$0xff]  ;;  %v678_v60 = vld [vmem:[%s794_s19 + $0x150] sm:$0xff] }
  0x22   : > { %634 = vmatmul.msk.f32.vlgmr.msra.gmra.mxu0 %vm203_vm0, %v835_v38  ;;  %636 = vmatmul.msk.f32.vlgmr.msra.gmra.mxu1 %vm203_vm0, %v835_v38  ;;  %v679_v61 = vld [vmem:[%s794_s19 + $0x158] sm:$0xff]  ;;  %v708_v62 = vld [vmem:[%s794_s19 + $0x1e0] sm:$0xff]  ;;  %v709_v63 = vld [vmem:[%s794_s19 + $0x1e8] sm:$0xff] }
  0x23   : > { %660 = vmatmul.msk.f32.vlgmr.msra.gmra.mxu2 %vm203_vm0, %v835_v38  ;;  %662 = vmatmul.msk.f32.vlgmr.msra.gmra.mxu3 %vm203_vm0, %v835_v38  ;;  %v676_v1 = vld [vmem:[%s794_s19 + $0x140] sm:$0xff]  ;;  %v677_v2 = vld [vmem:[%s794_s19 + $0x148] sm:$0xff]  ;;  %v706_v3 = vld [vmem:[%s794_s19 + $0x1d0] sm:$0xff] }
  0x24   : > { %409 = vmatpush.msrb.mxu0 %v688_v39  ;;  %432 = vmatpush.msrb.mxu1 %v689_v40  ;;  %v707_v4 = vld [vmem:[%s794_s19 + $0x1d8] sm:$0xff]  ;;  %v674_v5 = vld [vmem:[%s794_s19 + $0x130] sm:$0xff]  ;;  %v704_v7 = vld [vmem:[%s794_s19 + $0x1c0] sm:$0xff] }
  0x25   : > { %507 = vmatpush.msrb.mxu2 %v718_v41  ;;  %530 = vmatpush.msrb.mxu3 %v719_v42  ;;  %v675_v6 = vld [vmem:[%s794_s19 + $0x138] sm:$0xff]  ;;  %v705_v8 = vld [vmem:[%s794_s19 + $0x1c8] sm:$0xff]  ;;  %v672_v9 = vld [vmem:[%s794_s19 + $0x120] sm:$0xff] }
  0x26   : > { %410 = vmatpush.msrb.mxu0 %v686_v43  ;;  %433 = vmatpush.msrb.mxu1 %v687_v44  ;;  %v673_v10 = vld [vmem:[%s794_s19 + $0x128] sm:$0xff]  ;;  %v702_v11 = vld [vmem:[%s794_s19 + $0x1b0] sm:$0xff]  ;;  %v703_v12 = vld [vmem:[%s794_s19 + $0x1b8] sm:$0xff] }
  0x27   : > { %508 = vmatpush.msrb.mxu2 %v716_v45  ;;  %531 = vmatpush.msrb.mxu3 %v717_v46 }
  0x28   : > { %411 = vmatpush.msrb.mxu0 %v684_v47  ;;  %434 = vmatpush.msrb.mxu1 %v685_v48 }
  0x29   : > { %509 = vmatpush.msrb.mxu2 %v714_v49  ;;  %532 = vmatpush.msrb.mxu3 %v715_v50 }
  0x2a   : > { %412 = vmatpush.msrb.mxu0 %v682_v51  ;;  %435 = vmatpush.msrb.mxu1 %v683_v52 }
  0x2b   : > { %510 = vmatpush.msrb.mxu2 %v712_v53  ;;  %533 = vmatpush.msrb.mxu3 %v713_v54 }
  0x2c   : > { %635 = vmatmul.msk.f32.gmra.mxu0 %vm203_vm0, %v172_v55  ;;  %637 = vmatmul.msk.f32.gmra.mxu1 %vm203_vm0, %v172_v55 }
  0x2d   : > { %661 = vmatmul.msk.f32.gmra.mxu2 %vm203_vm0, %v172_v55  ;;  %663 = vmatmul.msk.f32.gmra.mxu3 %vm203_vm0, %v172_v55 }
  0x2e   : > { %413 = vmatpush.msrb.mxu0 %v680_v56  ;;  %436 = vmatpush.msrb.mxu1 %v681_v57 }
  0x2f   : > { %511 = vmatpush.msrb.mxu2 %v710_v58  ;;  %534 = vmatpush.msrb.mxu3 %v711_v59 }
  0x30   : > { %414 = vmatpush.msrb.mxu0 %v678_v60  ;;  %437 = vmatpush.msrb.mxu1 %v679_v61 }
  0x31   : > { %512 = vmatpush.msrb.mxu2 %v708_v62  ;;  %535 = vmatpush.msrb.mxu3 %v709_v63 }
  0x32   : > { %200 = vperm.xlu0 %746, %v174_v0   ;;  %415 = vmatpush.msrb.mxu0 %v676_v1 }
  0x33   : > { %438 = vmatpush.msrb.mxu1 %v677_v2  ;;  %513 = vmatpush.msrb.mxu2 %v706_v3 }
  0x34   : > { %536 = vmatpush.msrb.mxu3 %v707_v4  ;;  %416 = vmatpush.msrb.mxu0 %v674_v5 }
  0x35   : > { %439 = vmatpush.msrb.mxu1 %v675_v6  ;;  %514 = vmatpush.msrb.mxu2 %v704_v7 }
  0x36   : > { %537 = vmatpush.msrb.mxu3 %v705_v8  ;;  %417 = vmatpush.msrb.mxu0 %v672_v9 }
  0x37   : > { %440 = vmatpush.msrb.mxu1 %v673_v10  ;;  %515 = vmatpush.msrb.mxu2 %v702_v11 }
  0x38   : > { %538 = vmatpush.msrb.mxu3 %v703_v12  ;;  %690 = vmatmul.msk.f32.vlgmr.msrb.gmra.mxu0 %vm203_vm0, %v835_v38 }
  0x39   : > { %692 = vmatmul.msk.f32.vlgmr.msrb.gmra.mxu1 %vm203_vm0, %v835_v38  ;;  %720 = vmatmul.msk.f32.vlgmr.msrb.gmra.mxu2 %vm203_vm0, %v835_v38 }
  0x3a   : > { %722 = vmatmul.msk.f32.vlgmr.msrb.gmra.mxu3 %vm203_vm0, %v835_v38 }
  0x40   : > { %691 = vmatmul.msk.f32.gmra.mxu0 %vm203_vm0, %v172_v55 }
  0x41   : > { %693 = vmatmul.msk.f32.gmra.mxu1 %vm203_vm0, %v172_v55  ;;  %721 = vmatmul.msk.f32.gmra.mxu2 %vm203_vm0, %v172_v55 }
  0x42   : > { %723 = vmatmul.msk.f32.gmra.mxu3 %vm203_vm0, %v172_v55 }
  0x7f   : > { %v903_v13 = vpop.permute.xlu0 %195 }
  0x9f   : > { %v227_v14 = vpop.f32.mrf.mxu0  ;;  %v250_v15 = vpop.f32.mrf.mxu1 }
  0xa0   : > { %v228_v16 = vadd.f32 %v227_v14, %v903_v13  ;;  %v251_v17 = vadd.f32 %v250_v15, %v903_v13 }
  0xa2   : > { %vm260_vm1 = vcmp.ge.f32.partialorder %v228_v16, 1.0  ;;  %vm261_vm2 = vcmp.ge.f32.partialorder %v251_v17, 1.0 }
  0xa3   : > { %v638_v19 = vsel %vm260_vm1, 1.0, %v756_v18  ;;  %v639_v20 = vsel %vm261_vm2, 1.0, %v756_v18 }
  0xa4   : > { %272 = vst [vmem:[%s911_s29] sm:$0xff] %v638_v19  ;;  %v277_v21 = vsub.f32 1.0, %v638_v19  ;;  %v278_v22 = vsub.f32 1.0, %v639_v20  ;;  %v918_v27 = vpop.permute.xlu0 %200 }
  0xa5   : > { %274 = vst.msk [vmem:[%s911_s29 + $0x8] sm:$0xff] %vm273_vm3, %v639_v20 }
  0xa6   : > { %v281_v23 = vmul.f32 %v277_v21, %v228_v16  ;;  %v282_v24 = vmul.f32 %v278_v22, %v251_v17  ;;  %v321_v25 = vpop.f32.mrf.mxu2  ;;  %v344_v26 = vpop.f32.mrf.mxu3 }
  0xa7   : > { %v322_v30 = vadd.f32 %v321_v25, %v903_v13  ;;  %v345_v31 = vadd.f32 %v344_v26, %v903_v13 }
  0xa8   : > { %v350_v28 = vmul.f32 0.5, %v281_v23  ;;  %v351_v29 = vmul.f32 0.5, %v282_v24 }
  0xa9   : > { %v230_v32 = vpop.f32.mrf.mxu0  ;;  %v253_v33 = vpop.f32.mrf.mxu1 }
  0xaa   : > { %v354_v34 = vadd.f32 %v350_v28, %v322_v30  ;;  %v355_v35 = vadd.f32 %v351_v29, %v345_v31  ;;  %v231_v36 = vadd.f32 %v230_v32, %v918_v27  ;;  %v254_v37 = vadd.f32 %v253_v33, %v918_v27 }
  0xac   : > { %vm358_vm4 = vcmp.ge.f32.partialorder %v354_v34, 1.0  ;;  %vm359_vm5 = vcmp.ge.f32.partialorder %v355_v35, 1.0  ;;  %vm262_vm6 = vcmp.ge.f32.partialorder %v231_v36, 1.0  ;;  %vm263_vm7 = vcmp.ge.f32.partialorder %v254_v37, 1.0 }
  0xad   : > { %v664_v38 = vsel %vm358_vm4, 1.0, %v756_v18  ;;  %v665_v39 = vsel %vm359_vm5, 1.0, %v756_v18  ;;  %v640_v40 = vsel %vm262_vm6, 1.0, %v756_v18  ;;  %v641_v41 = vsel %vm263_vm7, 1.0, %v756_v18 }
  0xae   : > { %668 = vst [vmem:[%s911_s29 + $0x20] sm:$0xff] %v664_v38  ;;  %v375_v42 = vsub.f32 1.0, %v664_v38  ;;  %v376_v43 = vsub.f32 1.0, %v665_v39  ;;  %v279_v44 = vsub.f32 1.0, %v640_v40  ;;  %v280_v45 = vsub.f32 1.0, %v641_v41 }
  0xaf   : > { %669 = vst.msk [vmem:[%s911_s29 + $0x28] sm:$0xff] %vm273_vm3, %v665_v39 }
  0xb0   : > { %v379_v46 = vmul.f32 %v375_v42, %v354_v34  ;;  %275 = vst [vmem:[%s911_s29 + $0x10] sm:$0xff] %v640_v40  ;;  %v283_v47 = vmul.f32 %v279_v44, %v231_v36  ;;  %v284_v48 = vmul.f32 %v280_v45, %v254_v37  ;;  %v324_v49 = vpop.f32.mrf.mxu2  ;;  %v347_v50 = vpop.f32.mrf.mxu3  ;;  %v380_v51 = vmul.f32 %v376_v43, %v355_v35 }
  0xb1   : > { %276 = vst.msk [vmem:[%s911_s29 + $0x18] sm:$0xff] %vm273_vm3, %v641_v41  ;;  %v325_v54 = vadd.f32 %v324_v49, %v918_v27  ;;  %v348_v55 = vadd.f32 %v347_v50, %v918_v27 }
  0xb2   : > { %v352_v52 = vmul.f32 0.5, %v283_v47  ;;  %v353_v53 = vmul.f32 0.5, %v284_v48  ;;  %v448_v58 = vmul.f32 0.5, %v379_v46  ;;  %v449_v60 = vmul.f32 0.5, %v380_v51 }
  0xb4   : > { %v356_v56 = vadd.f32 %v352_v52, %v325_v54  ;;  %v357_v57 = vadd.f32 %v353_v53, %v348_v55 }
  0xb5   : > { %v419_v59 = vpop.f32.mrf.mxu0 }
  0xb6   : > { %vm360_vm8 = vcmp.ge.f32.partialorder %v356_v56, 1.0  ;;  %vm361_vm9 = vcmp.ge.f32.partialorder %v357_v57, 1.0  ;;  %v420_v61 = vadd.f32 %v419_v59, %v903_v13  ;;  %v442_v62 = vpop.f32.mrf.mxu1 }
  0xb7   : > { %v666_v63 = vsel %vm360_vm8, 1.0, %v756_v18  ;;  %v667_v0 = vsel %vm361_vm9, 1.0, %v756_v18  ;;  %v443_v1 = vadd.f32 %v442_v62, %v903_v13 }
  0xb8   : > { %670 = vst [vmem:[%s911_s29 + $0x30] sm:$0xff] %v666_v63  ;;  %v377_v2 = vsub.f32 1.0, %v666_v63  ;;  %v378_v3 = vsub.f32 1.0, %v667_v0  ;;  %v452_v4 = vadd.f32 %v448_v58, %v420_v61 }
  0xb9   : > { %671 = vst.msk [vmem:[%s911_s29 + $0x38] sm:$0xff] %vm273_vm3, %v667_v0  ;;  %v453_v5 = vadd.f32 %v449_v60, %v443_v1 }
  0xba   : > { %v381_v6 = vmul.f32 %v377_v2, %v356_v56  ;;  %v382_v7 = vmul.f32 %v378_v3, %v357_v57  ;;  %vm456_vm10 = vcmp.ge.f32.partialorder %v452_v4, 1.0 }
  0xbb   : > { %v694_v8 = vsel %vm456_vm10, 1.0, %v756_v18  ;;  %vm457_vm11 = vcmp.ge.f32.partialorder %v453_v5, 1.0 }
  0xbc   : > { %698 = vst [vmem:[%s911_s29 + $0x40] sm:$0xff] %v694_v8  ;;  %v473_v9 = vsub.f32 1.0, %v694_v8  ;;  %v695_v10 = vsel %vm457_vm11, 1.0, %v756_v18  ;;  %v517_v11 = vpop.f32.mrf.mxu2  ;;  %v450_v12 = vmul.f32 0.5, %v381_v6  ;;  %v451_v17 = vmul.f32 0.5, %v382_v7 }
  0xbd   : > { %699 = vst.msk [vmem:[%s911_s29 + $0x48] sm:$0xff] %vm273_vm3, %v695_v10  ;;  %v474_v14 = vsub.f32 1.0, %v695_v10  ;;  %v540_v15 = vpop.f32.mrf.mxu3  ;;  %v422_v16 = vpop.f32.mrf.mxu0  ;;  %v518_v24 = vadd.f32 %v517_v11, %v903_v13 }
  0xbe   : > { %v477_v19 = vmul.f32 %v473_v9, %v452_v4  ;;  %v423_v20 = vadd.f32 %v422_v16, %v918_v27  ;;  %v445_v21 = vpop.f32.mrf.mxu1  ;;  %v541_v28 = vadd.f32 %v540_v15, %v903_v13 }
  0xbf   : > { %v478_v22 = vmul.f32 %v474_v14, %v453_v5  ;;  %v446_v23 = vadd.f32 %v445_v21, %v918_v27 }
  0xc0   : > { %v546_v25 = vmul.f32 0.5, %v477_v19  ;;  %v454_v26 = vadd.f32 %v450_v12, %v423_v20 }
  0xc1   : > { %v547_v29 = vmul.f32 0.5, %v478_v22  ;;  %v455_v30 = vadd.f32 %v451_v17, %v446_v23 }
  0xc2   : > { %v550_v31 = vadd.f32 %v546_v25, %v518_v24  ;;  %vm458_vm12 = vcmp.ge.f32.partialorder %v454_v26, 1.0 }
  0xc3   : > { %v551_v32 = vadd.f32 %v547_v29, %v541_v28  ;;  %v696_v33 = vsel %vm458_vm12, 1.0, %v756_v18  ;;  %vm459_vm13 = vcmp.ge.f32.partialorder %v455_v30, 1.0 }
  0xc4   : > { %vm554_vm14 = vcmp.ge.f32.partialorder %v550_v31, 1.0  ;;  %700 = vst [vmem:[%s911_s29 + $0x50] sm:$0xff] %v696_v33  ;;  %v475_v34 = vsub.f32 1.0, %v696_v33  ;;  %v697_v35 = vsel %vm459_vm13, 1.0, %v756_v18  ;;  %v520_v37 = vpop.f32.mrf.mxu2 }
  0xc5   : > { %v724_v36 = vsel %vm554_vm14, 1.0, %v756_v18  ;;  %vm555_vm15 = vcmp.ge.f32.partialorder %v551_v32, 1.0  ;;  %701 = vst.msk [vmem:[%s911_s29 + $0x58] sm:$0xff] %vm273_vm3, %v697_v35  ;;  %v476_v13 = vsub.f32 1.0, %v697_v35  ;;  %v543_v40 = vpop.f32.mrf.mxu3  ;;  %v521_v42 = vadd.f32 %v520_v37, %v918_v27 }
  0xc6   : > { %728 = vst [vmem:[%s911_s29 + $0x60] sm:$0xff] %v724_v36  ;;  %v725_v38 = vsel %vm555_vm15, 1.0, %v756_v18  ;;  %v479_v39 = vmul.f32 %v475_v34, %v454_v26  ;;  %v544_v44 = vadd.f32 %v543_v40, %v918_v27 }
  0xc7   : > { %729 = vst.msk [vmem:[%s911_s29 + $0x68] sm:$0xff] %vm273_vm3, %v725_v38  ;;  %v480_v41 = vmul.f32 %v476_v13, %v455_v30 }
  0xc8   : > { %v548_v43 = vmul.f32 0.5, %v479_v39 }
  0xc9   : > { %v549_v45 = vmul.f32 0.5, %v480_v41 }
  0xca   : > { %v552_v46 = vadd.f32 %v548_v43, %v521_v42 }
  0xcb   : > { %v553_v47 = vadd.f32 %v549_v45, %v544_v44 }
  0xcc   : > { %vm556_vm0 = vcmp.ge.f32.partialorder %v552_v46, 1.0 }
  0xcd   : > { %v726_v48 = vsel %vm556_vm0, 1.0, %v756_v18  ;;  %vm557_vm1 = vcmp.ge.f32.partialorder %v553_v47, 1.0 }
  0xce   : > { %730 = vst [vmem:[%s911_s29 + $0x70] sm:$0xff] %v726_v48  ;;  %v727_v49 = vsel %vm557_vm1, 1.0, %v756_v18 }
  0xcf   : > { %731 = vst.msk [vmem:[%s911_s29 + $0x78] sm:$0xff] %vm273_vm3, %v727_v49 }
  0xd0 PF: > { %s13_s12 = sadd.s32 1, %s753_s12  }
  0xd1   : > { %p10_p4 = scmp.ge.s32.totalorder %s13_s12, 4  }
  0xd3   :  { %12 = sbr.rel (!%p10_p4) target bundleno = 1 (0x1), region = 68 }

</bundles_post_ra>
